<compile_context>
chip_gen: v7x
topology: tpu7x:2x2x1
jax: 0.10.0
libtpu: 0.0.40
codegen_flags: <defaults>
</compile_context>

<pallas_src>
from functools import partial

import jax
import jax.numpy as jnp
from jax.experimental import pallas as pl
from jax.experimental.pallas import tpu as pltpu


def _attention_pool_kernel(x_ref, pos0_ref, posx_ref, wkvq_ref, bkvq_ref,
                           wc_ref, bc_ref, sel_ref, selt_ref, o_ref,
                           *, num_heads: int):
    BB, T, C = x_ref.shape
    head_dim = C // num_heads
    cdt = wkvq_ref.dtype          # MXU input dtype (bf16 if weights were pre-cast)

    # --- token features (mean token kept separate: no (T+1)-row concat) ---------
    x = x_ref[...].astype(jnp.float32)                      # (BB, T, C)
    x0 = jnp.mean(x, axis=1) + pos0_ref[...]                # (BB, C)  mean tok + pos[0]
    xs = x + posx_ref[...][None, :, :]                      # (BB, T, C) frames + pos[1:]

    # --- fused projections (MXU), fp32 accumulate --------------------------------
    # mean token: [K | V | Q] in one (BB, C) @ (C, 3C) matmul
    kvq0 = jnp.dot(x0.astype(cdt), wkvq_ref[...],
                   preferred_element_type=jnp.float32) + bkvq_ref[...]
    k0 = kvq0[:, :C]                                        # (BB, C)
    v0 = kvq0[:, C:2 * C]                                   # (BB, C)
    q = kvq0[:, 2 * C:] * (head_dim ** -0.5)                # (BB, C), pre-scaled query

    # frame tokens: [K | V] in one (BB*T, C) @ (C, 2C) matmul (prefix slice of W_kvq)
    kv = jnp.dot(xs.reshape(BB * T, C).astype(cdt), wkvq_ref[:, :2 * C],
                 preferred_element_type=jnp.float32) + bkvq_ref[:, :2 * C]
    kx = kv[:, :C].reshape(BB, T, C)
    vx = kv[:, C:].reshape(BB, T, C)

    # --- lane-dense per-head scores: (q*k) reduced per head via selector matmul ---
    sel = sel_ref[...]                                      # (C, H) 0/1 selector
    selt = selt_ref[...]                                    # (H, C) 0/1 selector
    s0 = jnp.dot(q * k0, sel, preferred_element_type=jnp.float32)           # (BB, H)
    sx = jnp.dot((q[:, None, :] * kx).reshape(BB * T, C), sel,
                 preferred_element_type=jnp.float32).reshape(BB, T, num_heads)

    # --- softmax over the T+1 positions (token 0 is its own column), fp32 --------
    m = jnp.maximum(jnp.max(sx, axis=1), s0)                # (BB, H)
    p0 = jnp.exp(s0 - m)                                    # (BB, H)
    px = jnp.exp(sx - m[:, None, :])                        # (BB, T, H)
    denom = p0 + jnp.sum(px, axis=1)                        # (BB, H)
    inv = pl.reciprocal(denom, approx=True)                 # EUP slot; VALU stays free

    # --- weighted value sum: broadcast per-head probs across that head's lanes ----
    p0c = jnp.dot(p0, selt, preferred_element_type=jnp.float32)             # (BB, C)
    pxc = jnp.dot(px.reshape(BB * T, num_heads), selt,
                  preferred_element_type=jnp.float32).reshape(BB, T, C)
    invc = jnp.dot(inv, selt, preferred_element_type=jnp.float32)           # (BB, C)
    attn = (p0c * v0 + jnp.sum(pxc * vx, axis=1)) * invc                    # (BB, C)

    # --- output projection --------------------------------------------------------
    y = jnp.dot(attn.astype(cdt), wc_ref[...],
                preferred_element_type=jnp.float32) + bc_ref[...]
    o_ref[...] = y.astype(o_ref.dtype)                      # (BB, out_dim)


def attention_pool(x, pos_emb, wq, bq, wk, bk, wv, bv, wc, bc, *,
                   num_heads, block_b=None, mxu_dtype=None):
    """x: (B, T, C). Weights w*: (out, in) PyTorch convention; biases: (out,).

    block_b:   batch elements per grid step (default 32 -> ~256 K/V rows at T=8;
               use ~16 on v5e). Must be a multiple of 8 when smaller than B.
    mxu_dtype: dtype fed to the MXU (weights pre-cast in the wrapper, activations
               cast in-kernel). Pass jnp.bfloat16 on v6e/v7x; defaults to x.dtype.
    """
    B, T, C = x.shape
    out_dim = wc.shape[0]
    assert C % num_heads == 0

    if mxu_dtype is None:
        mxu_dtype = x.dtype
    if block_b is None:
        block_b = 32
    block_b = min(block_b, B)
    if block_b < B and block_b % 8:
        block_b = ((block_b + 7) // 8) * 8       # keep output block sublane-aligned

    nb = pl.cdiv(B, block_b)
    B_pad = nb * block_b
    x_p = jnp.pad(x, ((0, B_pad - B), (0, 0), (0, 0))) if B_pad != B else x

    # Fused [K | V | Q] weights, pre-transposed to (in, out); biases stay fp32.
    w_kvq = jnp.concatenate([wk.T, wv.T, wq.T], axis=1).astype(mxu_dtype)   # (C, 3C)
    b_kvq = jnp.concatenate([bk, bv, bq]).astype(jnp.float32)[None, :]      # (1, 3C)
    wc_t = wc.T.astype(mxu_dtype)                                           # (C, out)
    bc2 = bc.astype(jnp.float32)[None, :]                                   # (1, out)

    pos0 = pos_emb[:1].astype(jnp.float32)                                  # (1, C)
    posx = pos_emb[1:].astype(jnp.float32)                                  # (T, C)

    # 0/1 head selector: sel[c, h] == 1 iff lane c belongs to head h.
    head_ids = jnp.arange(C, dtype=jnp.int32) // (C // num_heads)
    sel = (head_ids[:, None] == jnp.arange(num_heads, dtype=jnp.int32)[None, :]
           ).astype(jnp.float32)                                            # (C, H)
    selt = sel.T                                                            # (H, C)

    kernel = partial(_attention_pool_kernel, num_heads=num_heads)
    args = (x_p, pos0, posx, w_kvq, b_kvq, wc_t, bc2, sel, selt)

    def _build(single_buffer_invariants):
        if single_buffer_invariants:
            # Grid-invariant blocks don't need double-buffering: halve their VMEM.
            def inv(shape):
                return pl.BlockSpec(shape, lambda b: (0,) * len(shape),
                                    pipeline_mode=pl.Buffered(1))
        else:
            def inv(shape):
                return pl.BlockSpec(shape, lambda b: (0,) * len(shape))

        return pl.pallas_call(
            kernel,
            out_shape=jax.ShapeDtypeStruct((B_pad, out_dim), x.dtype),
            grid_spec=pltpu.PrefetchScalarGridSpec(
                num_scalar_prefetch=0,
                grid=(nb,),
                in_specs=[
                    pl.BlockSpec((block_b, T, C), lambda b: (b, 0, 0)),  # x tile
                    inv((1, C)),                 # pos[0]
                    inv((T, C)),                 # pos[1:]
                    inv((C, 3 * C)),             # fused [K|V|Q] weight
                    inv((1, 3 * C)),             # fused [K|V|Q] bias
                    inv((C, out_dim)),           # c_proj weight
                    inv((1, out_dim)),           # c_proj bias
                    inv((C, num_heads)),         # head selector
                    inv((num_heads, C)),         # head selector (transposed)
                ],
                out_specs=pl.BlockSpec((block_b, out_dim), lambda b: (b, 0)),
            ),
            compiler_params=pltpu.CompilerParams(
                dimension_semantics=("parallel",),
                # TODO(synk): for large C (>=1024) set vmem_limit_bytes per-chip
                # (bf16 weights + batched activations); defaults are ample here.
            ),
        )

    try:
        out = _build(single_buffer_invariants=True)(*args)
    except Exception:
        # Fallback for Pallas builds that reject Buffered(1) single-buffering.
        out = _build(single_buffer_invariants=False)(*args)

    return out[:B]


def attention_pool_reference(x, pos_emb, wq, bq, wk, bk, wv, bv, wc, bc, *, num_heads):
    """Pure-JAX reference mirroring the PyTorch forward."""
    B, T, C = x.shape
    hd = C // num_heads
    xt = jnp.transpose(x, (1, 0, 2))                                    # (T, B, C)
    xs = jnp.concatenate([xt.mean(axis=0, keepdims=True), xt], axis=0)  # (T+1, B, C)
    xs = xs + pos_emb[:, None, :]
    q = (xs[0:1] @ wq.T + bq) * (hd ** -0.5)                            # (1, B, C)
    k = xs @ wk.T + bk                                                  # (T+1, B, C)
    v = xs @ wv.T + bv
    qh = q.reshape(1, B, num_heads, hd)
    kh = k.reshape(T + 1, B, num_heads, hd)
    vh = v.reshape(T + 1, B, num_heads, hd)
    s = jnp.einsum("qbhd,kbhd->bhqk", qh, kh)
    p = jax.nn.softmax(s, axis=-1)
    o = jnp.einsum("bhqk,kbhd->qbhd", p, vh).reshape(1, B, C)
    y = o @ wc.T + bc
    return y[0]                                                         # (B, out_dim)


if __name__ == "__main__":
    # Small config: frames=8, embed_dim=32, num_heads=4, output_dim=32, batch=2
    B, T, C, H = 2, 8, 32, 4
    OUT = 32

    key = jax.random.PRNGKey(0)
    ks = jax.random.split(key, 10)
    x = jax.random.normal(ks[0], (B, T, C), dtype=jnp.float32)
    pos_emb = jax.random.normal(ks[1], (T + 1, C), dtype=jnp.float32) / (C ** 0.5)
    wq = jax.random.normal(ks[2], (C, C), dtype=jnp.float32) * 0.1
    bq = jax.random.normal(ks[3], (C,), dtype=jnp.float32) * 0.1
    wk = jax.random.normal(ks[4], (C, C), dtype=jnp.float32) * 0.1
    bk = jax.random.normal(ks[5], (C,), dtype=jnp.float32) * 0.1
    wv = jax.random.normal(ks[6], (C, C), dtype=jnp.float32) * 0.1
    bv = jax.random.normal(ks[7], (C,), dtype=jnp.float32) * 0.1
    wc = jax.random.normal(ks[8], (OUT, C), dtype=jnp.float32) * 0.1
    bc = jax.random.normal(ks[9], (OUT,), dtype=jnp.float32) * 0.1

    out = attention_pool(x, pos_emb, wq, bq, wk, bk, wv, bv, wc, bc, num_heads=H)
    out = jax.block_until_ready(out)

    ref = attention_pool_reference(x, pos_emb, wq, bq, wk, bk, wv, bv, wc, bc,
                                   num_heads=H)
    assert out.shape == (B, OUT)
    # Tolerance loosened slightly vs fp32-exact because the softmax denominator uses
    # the EUP approximate reciprocal (pl.reciprocal(..., approx=True)).
    assert jnp.allclose(out, ref, atol=2e-3, rtol=2e-3), "mismatch vs reference"

    print("KERNEL_OK")
</pallas_src>

<mosaic_0001>
module attributes {stable_mosaic.version = 11 : i64} {
  func.func @_attention_pool_kernel(%arg0: i32, %arg1: memref<2x8x32xf32, #tpu.memory_space<vmem>>, %arg2: memref<1x32xf32, #tpu.memory_space<vmem>>, %arg3: memref<8x32xf32, #tpu.memory_space<vmem>>, %arg4: memref<32x96xf32, #tpu.memory_space<vmem>>, %arg5: memref<1x96xf32, #tpu.memory_space<vmem>>, %arg6: memref<32x32xf32, #tpu.memory_space<vmem>>, %arg7: memref<1x32xf32, #tpu.memory_space<vmem>>, %arg8: memref<32x4xf32, #tpu.memory_space<vmem>>, %arg9: memref<4x32xf32, #tpu.memory_space<vmem>>, %arg10: memref<2x32xf32, #tpu.memory_space<vmem>>) attributes {dimension_semantics = [#tpu.dimension_semantics<parallel>], iteration_bounds = array<i64: 1>, scalar_prefetch = 0 : i64, scratch_operands = 0 : i64, tpu.core_type = #tpu.core_type<tc>, window_params = [{transform_indices = @transform_0, window_bounds = array<i64: 2, 8, 32>}, {pipeline_mode = #tpu.pipeline_mode<synchronous>, transform_indices = @transform_1, window_bounds = array<i64: 1, 32>}, {pipeline_mode = #tpu.pipeline_mode<synchronous>, transform_indices = @transform_2, window_bounds = array<i64: 8, 32>}, {pipeline_mode = #tpu.pipeline_mode<synchronous>, transform_indices = @transform_3, window_bounds = array<i64: 32, 96>}, {pipeline_mode = #tpu.pipeline_mode<synchronous>, transform_indices = @transform_4, window_bounds = array<i64: 1, 96>}, {pipeline_mode = #tpu.pipeline_mode<synchronous>, transform_indices = @transform_5, window_bounds = array<i64: 32, 32>}, {pipeline_mode = #tpu.pipeline_mode<synchronous>, transform_indices = @transform_6, window_bounds = array<i64: 1, 32>}, {pipeline_mode = #tpu.pipeline_mode<synchronous>, transform_indices = @transform_7, window_bounds = array<i64: 32, 4>}, {pipeline_mode = #tpu.pipeline_mode<synchronous>, transform_indices = @transform_8, window_bounds = array<i64: 4, 32>}, {transform_indices = @transform_9, window_bounds = array<i64: 2, 32>}]} {
    %c0 = arith.constant 0 : index
    %c0_0 = arith.constant 0 : index
    %c0_1 = arith.constant 0 : index
    %0 = vector.load %arg1[%c0, %c0_0, %c0_1] : memref<2x8x32xf32, #tpu.memory_space<vmem>>, vector<2x8x32xf32>
    %cst = arith.constant dense<0.000000e+00> : vector<2x32xf32>
    %1 = vector.multi_reduction <add>, %0, %cst [1] : vector<2x8x32xf32> to vector<2x32xf32>
    %cst_2 = arith.constant 8.000000e+00 : f32
    %2 = vector.broadcast %cst_2 : f32 to vector<2x32xf32>
    %3 = arith.divf %1, %2 : vector<2x32xf32>
    %c0_3 = arith.constant 0 : index
    %c0_4 = arith.constant 0 : index
    %4 = vector.load %arg2[%c0_3, %c0_4] : memref<1x32xf32, #tpu.memory_space<vmem>>, vector<1x32xf32>
    %5 = vector.broadcast %4 : vector<1x32xf32> to vector<2x32xf32>
    %6 = arith.addf %3, %5 : vector<2x32xf32>
    %c0_5 = arith.constant 0 : index
    %c0_6 = arith.constant 0 : index
    %7 = vector.load %arg3[%c0_5, %c0_6] : memref<8x32xf32, #tpu.memory_space<vmem>>, vector<8x32xf32>
    %8 = vector.shape_cast %7 : vector<8x32xf32> to vector<1x8x32xf32>
    %9 = vector.broadcast %8 : vector<1x8x32xf32> to vector<2x8x32xf32>
    %10 = arith.addf %0, %9 : vector<2x8x32xf32>
    %c0_7 = arith.constant 0 : index
    %c0_8 = arith.constant 0 : index
    %11 = vector.load %arg4[%c0_7, %c0_8] : memref<32x96xf32, #tpu.memory_space<vmem>>, vector<32x96xf32>
    %cst_9 = arith.constant dense<0.000000e+00> : vector<2x96xf32>
    %12 = tpu.matmul %6, %11, %cst_9 {dimension_numbers = #tpu.dot_dimension_numbers<[1], [0], [0], [1], [0, 0, 1, 1], [], []>} : vector<2x32xf32>, vector<32x96xf32>, vector<2x96xf32> -> vector<2x96xf32>
    %c0_10 = arith.constant 0 : index
    %c0_11 = arith.constant 0 : index
    %13 = vector.load %arg5[%c0_10, %c0_11] : memref<1x96xf32, #tpu.memory_space<vmem>>, vector<1x96xf32>
    %14 = vector.broadcast %13 : vector<1x96xf32> to vector<2x96xf32>
    %15 = arith.addf %12, %14 : vector<2x96xf32>
    %16 = vector.extract_strided_slice %15 {offsets = [0, 0], sizes = [2, 32], strides = [1, 1]} : vector<2x96xf32> to vector<2x32xf32>
    %17 = vector.extract_strided_slice %15 {offsets = [0, 32], sizes = [2, 32], strides = [1, 1]} : vector<2x96xf32> to vector<2x32xf32>
    %18 = vector.extract_strided_slice %15 {offsets = [0, 64], sizes = [2, 32], strides = [1, 1]} : vector<2x96xf32> to vector<2x32xf32>
    %cst_12 = arith.constant 0.353553385 : f32
    %19 = vector.broadcast %cst_12 : f32 to vector<2x32xf32>
    %20 = arith.mulf %18, %19 : vector<2x32xf32>
    %21 = vector.shape_cast %10 : vector<2x8x32xf32> to vector<16x32xf32>
    %c0_13 = arith.constant 0 : index
    %c0_14 = arith.constant 0 : index
    %22 = vector.load %arg4[%c0_13, %c0_14] : memref<32x96xf32, #tpu.memory_space<vmem>>, vector<32x64xf32>
    %cst_15 = arith.constant dense<0.000000e+00> : vector<16x64xf32>
    %23 = tpu.matmul %21, %22, %cst_15 {dimension_numbers = #tpu.dot_dimension_numbers<[1], [0], [0], [1], [0, 0, 1, 1], [], []>} : vector<16x32xf32>, vector<32x64xf32>, vector<16x64xf32> -> vector<16x64xf32>
    %c0_16 = arith.constant 0 : index
    %c0_17 = arith.constant 0 : index
    %24 = vector.load %arg5[%c0_16, %c0_17] : memref<1x96xf32, #tpu.memory_space<vmem>>, vector<1x64xf32>
    %25 = vector.broadcast %24 : vector<1x64xf32> to vector<16x64xf32>
    %26 = arith.addf %23, %25 : vector<16x64xf32>
    %27 = vector.extract_strided_slice %26 {offsets = [0, 0], sizes = [16, 32], strides = [1, 1]} : vector<16x64xf32> to vector<16x32xf32>
    %28 = vector.shape_cast %27 : vector<16x32xf32> to vector<2x8x32xf32>
    %29 = vector.extract_strided_slice %26 {offsets = [0, 32], sizes = [16, 32], strides = [1, 1]} : vector<16x64xf32> to vector<16x32xf32>
    %30 = vector.shape_cast %29 : vector<16x32xf32> to vector<2x8x32xf32>
    %c0_18 = arith.constant 0 : index
    %c0_19 = arith.constant 0 : index
    %31 = vector.load %arg8[%c0_18, %c0_19] : memref<32x4xf32, #tpu.memory_space<vmem>>, vector<32x4xf32>
    %c0_20 = arith.constant 0 : index
    %c0_21 = arith.constant 0 : index
    %32 = vector.load %arg9[%c0_20, %c0_21] : memref<4x32xf32, #tpu.memory_space<vmem>>, vector<4x32xf32>
    %33 = arith.mulf %20, %16 : vector<2x32xf32>
    %cst_22 = arith.constant dense<0.000000e+00> : vector<2x4xf32>
    %34 = tpu.matmul %33, %31, %cst_22 {dimension_numbers = #tpu.dot_dimension_numbers<[1], [0], [0], [1], [0, 0, 1, 1], [], []>} : vector<2x32xf32>, vector<32x4xf32>, vector<2x4xf32> -> vector<2x4xf32>
    %35 = vector.shape_cast %20 : vector<2x32xf32> to vector<2x1x32xf32>
    %36 = vector.broadcast %35 : vector<2x1x32xf32> to vector<2x8x32xf32>
    %37 = arith.mulf %36, %28 : vector<2x8x32xf32>
    %38 = vector.shape_cast %37 : vector<2x8x32xf32> to vector<16x32xf32>
    %cst_23 = arith.constant dense<0.000000e+00> : vector<16x4xf32>
    %39 = tpu.matmul %38, %31, %cst_23 {dimension_numbers = #tpu.dot_dimension_numbers<[1], [0], [0], [1], [0, 0, 1, 1], [], []>} : vector<16x32xf32>, vector<32x4xf32>, vector<16x4xf32> -> vector<16x4xf32>
    %40 = vector.shape_cast %39 : vector<16x4xf32> to vector<2x8x4xf32>
    %cst_24 = arith.constant dense<0xFF800000> : vector<2x4xf32>
    %41 = vector.multi_reduction <maximumf>, %40, %cst_24 [1] : vector<2x8x4xf32> to vector<2x4xf32>
    %42 = arith.maximumf %41, %34 : vector<2x4xf32>
    %43 = arith.subf %34, %42 : vector<2x4xf32>
    %44 = math.exp %43 : vector<2x4xf32>
    %45 = vector.shape_cast %42 : vector<2x4xf32> to vector<2x1x4xf32>
    %46 = vector.broadcast %45 : vector<2x1x4xf32> to vector<2x8x4xf32>
    %47 = arith.subf %40, %46 : vector<2x8x4xf32>
    %48 = math.exp %47 : vector<2x8x4xf32>
    %cst_25 = arith.constant dense<0.000000e+00> : vector<2x4xf32>
    %49 = vector.multi_reduction <add>, %48, %cst_25 [1] : vector<2x8x4xf32> to vector<2x4xf32>
    %50 = arith.addf %44, %49 : vector<2x4xf32>
    %51 = tpu.reciprocal %50 {approx = true} : vector<2x4xf32> -> vector<2x4xf32>
    %cst_26 = arith.constant dense<0.000000e+00> : vector<2x32xf32>
    %52 = tpu.matmul %44, %32, %cst_26 {dimension_numbers = #tpu.dot_dimension_numbers<[1], [0], [0], [1], [0, 0, 1, 1], [], []>} : vector<2x4xf32>, vector<4x32xf32>, vector<2x32xf32> -> vector<2x32xf32>
    %53 = vector.shape_cast %48 : vector<2x8x4xf32> to vector<16x4xf32>
    %cst_27 = arith.constant dense<0.000000e+00> : vector<16x32xf32>
    %54 = tpu.matmul %53, %32, %cst_27 {dimension_numbers = #tpu.dot_dimension_numbers<[1], [0], [0], [1], [0, 0, 1, 1], [], []>} : vector<16x4xf32>, vector<4x32xf32>, vector<16x32xf32> -> vector<16x32xf32>
    %55 = vector.shape_cast %54 : vector<16x32xf32> to vector<2x8x32xf32>
    %cst_28 = arith.constant dense<0.000000e+00> : vector<2x32xf32>
    %56 = tpu.matmul %51, %32, %cst_28 {dimension_numbers = #tpu.dot_dimension_numbers<[1], [0], [0], [1], [0, 0, 1, 1], [], []>} : vector<2x4xf32>, vector<4x32xf32>, vector<2x32xf32> -> vector<2x32xf32>
    %57 = arith.mulf %52, %17 : vector<2x32xf32>
    %58 = arith.mulf %55, %30 : vector<2x8x32xf32>
    %cst_29 = arith.constant dense<0.000000e+00> : vector<2x32xf32>
    %59 = vector.multi_reduction <add>, %58, %cst_29 [1] : vector<2x8x32xf32> to vector<2x32xf32>
    %60 = arith.addf %57, %59 : vector<2x32xf32>
    %61 = arith.mulf %60, %56 : vector<2x32xf32>
    %c0_30 = arith.constant 0 : index
    %c0_31 = arith.constant 0 : index
    %62 = vector.load %arg6[%c0_30, %c0_31] : memref<32x32xf32, #tpu.memory_space<vmem>>, vector<32x32xf32>
    %cst_32 = arith.constant dense<0.000000e+00> : vector<2x32xf32>
    %63 = tpu.matmul %61, %62, %cst_32 {dimension_numbers = #tpu.dot_dimension_numbers<[1], [0], [0], [1], [0, 0, 1, 1], [], []>} : vector<2x32xf32>, vector<32x32xf32>, vector<2x32xf32> -> vector<2x32xf32>
    %c0_33 = arith.constant 0 : index
    %c0_34 = arith.constant 0 : index
    %64 = vector.load %arg7[%c0_33, %c0_34] : memref<1x32xf32, #tpu.memory_space<vmem>>, vector<1x32xf32>
    %65 = vector.broadcast %64 : vector<1x32xf32> to vector<2x32xf32>
    %66 = arith.addf %63, %65 : vector<2x32xf32>
    %c0_35 = arith.constant 0 : index
    %c0_36 = arith.constant 0 : index
    %67 = vector.load %arg10[%c0_35, %c0_36] : memref<2x32xf32, #tpu.memory_space<vmem>>, vector<2x32xf32>
    tpu.vector_store %arg10[%c0_35, %c0_36], %66 {strides = array<i32>} : memref<2x32xf32, #tpu.memory_space<vmem>>, vector<2x32xf32>,
    return
  }
  func.func @transform_0(%arg0: i32) -> (i32, i32, i32) {
    %c0_i32 = arith.constant 0 : i32
    %c0_i32_0 = arith.constant 0 : i32
    %c0_i32_1 = arith.constant 0 : i32
    return %arg0, %c0_i32, %c0_i32_0 : i32, i32, i32
  }
  func.func @transform_1(%arg0: i32) -> (i32, i32) {
    %c0_i32 = arith.constant 0 : i32
    %c0_i32_0 = arith.constant 0 : i32
    %c0_i32_1 = arith.constant 0 : i32
    return %c0_i32, %c0_i32_0 : i32, i32
  }
  func.func @transform_2(%arg0: i32) -> (i32, i32) {
    %c0_i32 = arith.constant 0 : i32
    %c0_i32_0 = arith.constant 0 : i32
    %c0_i32_1 = arith.constant 0 : i32
    return %c0_i32, %c0_i32_0 : i32, i32
  }
  func.func @transform_3(%arg0: i32) -> (i32, i32) {
    %c0_i32 = arith.constant 0 : i32
    %c0_i32_0 = arith.constant 0 : i32
    %c0_i32_1 = arith.constant 0 : i32
    return %c0_i32, %c0_i32_0 : i32, i32
  }
  func.func @transform_4(%arg0: i32) -> (i32, i32) {
    %c0_i32 = arith.constant 0 : i32
    %c0_i32_0 = arith.constant 0 : i32
    %c0_i32_1 = arith.constant 0 : i32
    return %c0_i32, %c0_i32_0 : i32, i32
  }
  func.func @transform_5(%arg0: i32) -> (i32, i32) {
    %c0_i32 = arith.constant 0 : i32
    %c0_i32_0 = arith.constant 0 : i32
    %c0_i32_1 = arith.constant 0 : i32
    return %c0_i32, %c0_i32_0 : i32, i32
  }
  func.func @transform_6(%arg0: i32) -> (i32, i32) {
    %c0_i32 = arith.constant 0 : i32
    %c0_i32_0 = arith.constant 0 : i32
    %c0_i32_1 = arith.constant 0 : i32
    return %c0_i32, %c0_i32_0 : i32, i32
  }
  func.func @transform_7(%arg0: i32) -> (i32, i32) {
    %c0_i32 = arith.constant 0 : i32
    %c0_i32_0 = arith.constant 0 : i32
    %c0_i32_1 = arith.constant 0 : i32
    return %c0_i32, %c0_i32_0 : i32, i32
  }
  func.func @transform_8(%arg0: i32) -> (i32, i32) {
    %c0_i32 = arith.constant 0 : i32
    %c0_i32_0 = arith.constant 0 : i32
    %c0_i32_1 = arith.constant 0 : i32
    return %c0_i32, %c0_i32_0 : i32, i32
  }
  func.func @transform_9(%arg0: i32) -> (i32, i32) {
    %c0_i32 = arith.constant 0 : i32
    %c0_i32_0 = arith.constant 0 : i32
    return %arg0, %c0_i32 : i32, i32
  }
}

module attributes {stable_mosaic.version = 11 : i64} {
  func.func @_attention_pool_kernel(%arg0: i32, %arg1: memref<2x8x32xf32, #tpu.memory_space<vmem>>, %arg2: memref<1x32xf32, #tpu.memory_space<vmem>>, %arg3: memref<8x32xf32, #tpu.memory_space<vmem>>, %arg4: memref<32x96xf32, #tpu.memory_space<vmem>>, %arg5: memref<1x96xf32, #tpu.memory_space<vmem>>, %arg6: memref<32x32xf32, #tpu.memory_space<vmem>>, %arg7: memref<1x32xf32, #tpu.memory_space<vmem>>, %arg8: memref<32x4xf32, #tpu.memory_space<vmem>>, %arg9: memref<4x32xf32, #tpu.memory_space<vmem>>, %arg10: memref<2x32xf32, #tpu.memory_space<vmem>>) attributes {dimension_semantics = [#tpu.dimension_semantics<parallel>], iteration_bounds = array<i64: 1>, scalar_prefetch = 0 : i64, scratch_operands = 0 : i64, tpu.core_type = #tpu.core_type<tc>, window_params = [{transform_indices = @transform_0, window_bounds = array<i64: 2, 8, 32>}, {pipeline_mode = #tpu.pipeline_mode<synchronous>, transform_indices = @transform_1, window_bounds = array<i64: 1, 32>}, {pipeline_mode = #tpu.pipeline_mode<synchronous>, transform_indices = @transform_2, window_bounds = array<i64: 8, 32>}, {pipeline_mode = #tpu.pipeline_mode<synchronous>, transform_indices = @transform_3, window_bounds = array<i64: 32, 96>}, {pipeline_mode = #tpu.pipeline_mode<synchronous>, transform_indices = @transform_4, window_bounds = array<i64: 1, 96>}, {pipeline_mode = #tpu.pipeline_mode<synchronous>, transform_indices = @transform_5, window_bounds = array<i64: 32, 32>}, {pipeline_mode = #tpu.pipeline_mode<synchronous>, transform_indices = @transform_6, window_bounds = array<i64: 1, 32>}, {pipeline_mode = #tpu.pipeline_mode<synchronous>, transform_indices = @transform_7, window_bounds = array<i64: 32, 4>}, {pipeline_mode = #tpu.pipeline_mode<synchronous>, transform_indices = @transform_8, window_bounds = array<i64: 4, 32>}, {transform_indices = @transform_9, window_bounds = array<i64: 2, 32>}]} {
    %c0 = arith.constant 0 : index
    %c0_0 = arith.constant 0 : index
    %c0_1 = arith.constant 0 : index
    %0 = vector.load %arg1[%c0, %c0_0, %c0_1] : memref<2x8x32xf32, #tpu.memory_space<vmem>>, vector<2x8x32xf32>
    %cst = arith.constant dense<0.000000e+00> : vector<2x32xf32>
    %1 = vector.multi_reduction <add>, %0, %cst [1] : vector<2x8x32xf32> to vector<2x32xf32>
    %cst_2 = arith.constant 8.000000e+00 : f32
    %2 = vector.broadcast %cst_2 : f32 to vector<2x32xf32>
    %3 = arith.divf %1, %2 : vector<2x32xf32>
    %c0_3 = arith.constant 0 : index
    %c0_4 = arith.constant 0 : index
    %4 = vector.load %arg2[%c0_3, %c0_4] : memref<1x32xf32, #tpu.memory_space<vmem>>, vector<1x32xf32>
    %5 = vector.broadcast %4 : vector<1x32xf32> to vector<2x32xf32>
    %6 = arith.addf %3, %5 : vector<2x32xf32>
    %c0_5 = arith.constant 0 : index
    %c0_6 = arith.constant 0 : index
    %7 = vector.load %arg3[%c0_5, %c0_6] : memref<8x32xf32, #tpu.memory_space<vmem>>, vector<8x32xf32>
    %8 = vector.shape_cast %7 : vector<8x32xf32> to vector<1x8x32xf32>
    %9 = vector.broadcast %8 : vector<1x8x32xf32> to vector<2x8x32xf32>
    %10 = arith.addf %0, %9 : vector<2x8x32xf32>
    %c0_7 = arith.constant 0 : index
    %c0_8 = arith.constant 0 : index
    %11 = vector.load %arg4[%c0_7, %c0_8] : memref<32x96xf32, #tpu.memory_space<vmem>>, vector<32x96xf32>
    %cst_9 = arith.constant dense<0.000000e+00> : vector<2x96xf32>
    %12 = tpu.matmul %6, %11, %cst_9 {dimension_numbers = #tpu.dot_dimension_numbers<[1], [0], [0], [1], [0, 0, 1, 1], [], []>} : vector<2x32xf32>, vector<32x96xf32>, vector<2x96xf32> -> vector<2x96xf32>
    %c0_10 = arith.constant 0 : index
    %c0_11 = arith.constant 0 : index
    %13 = vector.load %arg5[%c0_10, %c0_11] : memref<1x96xf32, #tpu.memory_space<vmem>>, vector<1x96xf32>
    %14 = vector.broadcast %13 : vector<1x96xf32> to vector<2x96xf32>
    %15 = arith.addf %12, %14 : vector<2x96xf32>
    %16 = vector.extract_strided_slice %15 {offsets = [0, 0], sizes = [2, 32], strides = [1, 1]} : vector<2x96xf32> to vector<2x32xf32>
    %17 = vector.extract_strided_slice %15 {offsets = [0, 32], sizes = [2, 32], strides = [1, 1]} : vector<2x96xf32> to vector<2x32xf32>
    %18 = vector.extract_strided_slice %15 {offsets = [0, 64], sizes = [2, 32], strides = [1, 1]} : vector<2x96xf32> to vector<2x32xf32>
    %cst_12 = arith.constant 0.353553385 : f32
    %19 = vector.broadcast %cst_12 : f32 to vector<2x32xf32>
    %20 = arith.mulf %18, %19 : vector<2x32xf32>
    %21 = vector.shape_cast %10 : vector<2x8x32xf32> to vector<16x32xf32>
    %c0_13 = arith.constant 0 : index
    %c0_14 = arith.constant 0 : index
    %22 = vector.load %arg4[%c0_13, %c0_14] : memref<32x96xf32, #tpu.memory_space<vmem>>, vector<32x64xf32>
    %cst_15 = arith.constant dense<0.000000e+00> : vector<16x64xf32>
    %23 = tpu.matmul %21, %22, %cst_15 {dimension_numbers = #tpu.dot_dimension_numbers<[1], [0], [0], [1], [0, 0, 1, 1], [], []>} : vector<16x32xf32>, vector<32x64xf32>, vector<16x64xf32> -> vector<16x64xf32>
    %c0_16 = arith.constant 0 : index
    %c0_17 = arith.constant 0 : index
    %24 = vector.load %arg5[%c0_16, %c0_17] : memref<1x96xf32, #tpu.memory_space<vmem>>, vector<1x64xf32>
    %25 = vector.broadcast %24 : vector<1x64xf32> to vector<16x64xf32>
    %26 = arith.addf %23, %25 : vector<16x64xf32>
    %27 = vector.extract_strided_slice %26 {offsets = [0, 0], sizes = [16, 32], strides = [1, 1]} : vector<16x64xf32> to vector<16x32xf32>
    %28 = vector.shape_cast %27 : vector<16x32xf32> to vector<2x8x32xf32>
    %29 = vector.extract_strided_slice %26 {offsets = [0, 32], sizes = [16, 32], strides = [1, 1]} : vector<16x64xf32> to vector<16x32xf32>
    %30 = vector.shape_cast %29 : vector<16x32xf32> to vector<2x8x32xf32>
    %c0_18 = arith.constant 0 : index
    %c0_19 = arith.constant 0 : index
    %31 = vector.load %arg8[%c0_18, %c0_19] : memref<32x4xf32, #tpu.memory_space<vmem>>, vector<32x4xf32>
    %c0_20 = arith.constant 0 : index
    %c0_21 = arith.constant 0 : index
    %32 = vector.load %arg9[%c0_20, %c0_21] : memref<4x32xf32, #tpu.memory_space<vmem>>, vector<4x32xf32>
    %33 = arith.mulf %20, %16 : vector<2x32xf32>
    %cst_22 = arith.constant dense<0.000000e+00> : vector<2x4xf32>
    %34 = tpu.matmul %33, %31, %cst_22 {dimension_numbers = #tpu.dot_dimension_numbers<[1], [0], [0], [1], [0, 0, 1, 1], [], []>} : vector<2x32xf32>, vector<32x4xf32>, vector<2x4xf32> -> vector<2x4xf32>
    %35 = vector.shape_cast %20 : vector<2x32xf32> to vector<2x1x32xf32>
    %36 = vector.broadcast %35 : vector<2x1x32xf32> to vector<2x8x32xf32>
    %37 = arith.mulf %36, %28 : vector<2x8x32xf32>
    %38 = vector.shape_cast %37 : vector<2x8x32xf32> to vector<16x32xf32>
    %cst_23 = arith.constant dense<0.000000e+00> : vector<16x4xf32>
    %39 = tpu.matmul %38, %31, %cst_23 {dimension_numbers = #tpu.dot_dimension_numbers<[1], [0], [0], [1], [0, 0, 1, 1], [], []>} : vector<16x32xf32>, vector<32x4xf32>, vector<16x4xf32> -> vector<16x4xf32>
    %40 = vector.shape_cast %39 : vector<16x4xf32> to vector<2x8x4xf32>
    %cst_24 = arith.constant dense<0xFF800000> : vector<2x4xf32>
    %41 = vector.multi_reduction <maximumf>, %40, %cst_24 [1] : vector<2x8x4xf32> to vector<2x4xf32>
    %42 = arith.maximumf %41, %34 : vector<2x4xf32>
    %43 = arith.subf %34, %42 : vector<2x4xf32>
    %44 = math.exp %43 : vector<2x4xf32>
    %45 = vector.shape_cast %42 : vector<2x4xf32> to vector<2x1x4xf32>
    %46 = vector.broadcast %45 : vector<2x1x4xf32> to vector<2x8x4xf32>
    %47 = arith.subf %40, %46 : vector<2x8x4xf32>
    %48 = math.exp %47 : vector<2x8x4xf32>
    %cst_25 = arith.constant dense<0.000000e+00> : vector<2x4xf32>
    %49 = vector.multi_reduction <add>, %48, %cst_25 [1] : vector<2x8x4xf32> to vector<2x4xf32>
    %50 = arith.addf %44, %49 : vector<2x4xf32>
    %51 = tpu.reciprocal %50 {approx = true} : vector<2x4xf32> -> vector<2x4xf32>
    %cst_26 = arith.constant dense<0.000000e+00> : vector<2x32xf32>
    %52 = tpu.matmul %44, %32, %cst_26 {dimension_numbers = #tpu.dot_dimension_numbers<[1], [0], [0], [1], [0, 0, 1, 1], [], []>} : vector<2x4xf32>, vector<4x32xf32>, vector<2x32xf32> -> vector<2x32xf32>
    %53 = vector.shape_cast %48 : vector<2x8x4xf32> to vector<16x4xf32>
    %cst_27 = arith.constant dense<0.000000e+00> : vector<16x32xf32>
    %54 = tpu.matmul %53, %32, %cst_27 {dimension_numbers = #tpu.dot_dimension_numbers<[1], [0], [0], [1], [0, 0, 1, 1], [], []>} : vector<16x4xf32>, vector<4x32xf32>, vector<16x32xf32> -> vector<16x32xf32>
    %55 = vector.shape_cast %54 : vector<16x32xf32> to vector<2x8x32xf32>
    %cst_28 = arith.constant dense<0.000000e+00> : vector<2x32xf32>
    %56 = tpu.matmul %51, %32, %cst_28 {dimension_numbers = #tpu.dot_dimension_numbers<[1], [0], [0], [1], [0, 0, 1, 1], [], []>} : vector<2x4xf32>, vector<4x32xf32>, vector<2x32xf32> -> vector<2x32xf32>
    %57 = arith.mulf %52, %17 : vector<2x32xf32>
    %58 = arith.mulf %55, %30 : vector<2x8x32xf32>
    %cst_29 = arith.constant dense<0.000000e+00> : vector<2x32xf32>
    %59 = vector.multi_reduction <add>, %58, %cst_29 [1] : vector<2x8x32xf32> to vector<2x32xf32>
    %60 = arith.addf %57, %59 : vector<2x32xf32>
    %61 = arith.mulf %60, %56 : vector<2x32xf32>
    %c0_30 = arith.constant 0 : index
    %c0_31 = arith.constant 0 : index
    %62 = vector.load %arg6[%c0_30, %c0_31] : memref<32x32xf32, #tpu.memory_space<vmem>>, vector<32x32xf32>
    %cst_32 = arith.constant dense<0.000000e+00> : vector<2x32xf32>
    %63 = tpu.matmul %61, %62, %cst_32 {dimension_numbers = #tpu.dot_dimension_numbers<[1], [0], [0], [1], [0, 0, 1, 1], [], []>} : vector<2x32xf32>, vector<32x32xf32>, vector<2x32xf32> -> vector<2x32xf32>
    %c0_33 = arith.constant 0 : index
    %c0_34 = arith.constant 0 : index
    %64 = vector.load %arg7[%c0_33, %c0_34] : memref<1x32xf32, #tpu.memory_space<vmem>>, vector<1x32xf32>
    %65 = vector.broadcast %64 : vector<1x32xf32> to vector<2x32xf32>
    %66 = arith.addf %63, %65 : vector<2x32xf32>
    %c0_35 = arith.constant 0 : index
    %c0_36 = arith.constant 0 : index
    %67 = vector.load %arg10[%c0_35, %c0_36] : memref<2x32xf32, #tpu.memory_space<vmem>>, vector<2x32xf32>
    tpu.vector_store %arg10[%c0_35, %c0_36], %66 {strides = array<i32>} : memref<2x32xf32, #tpu.memory_space<vmem>>, vector<2x32xf32>,
    return
  }
  func.func @transform_0(%arg0: i32) -> (i32, i32, i32) {
    %c0_i32 = arith.constant 0 : i32
    %c0_i32_0 = arith.constant 0 : i32
    %c0_i32_1 = arith.constant 0 : i32
    return %arg0, %c0_i32, %c0_i32_0 : i32, i32, i32
  }
  func.func @transform_1(%arg0: i32) -> (i32, i32) {
    %c0_i32 = arith.constant 0 : i32
    %c0_i32_0 = arith.constant 0 : i32
    %c0_i32_1 = arith.constant 0 : i32
    return %c0_i32, %c0_i32_0 : i32, i32
  }
  func.func @transform_2(%arg0: i32) -> (i32, i32) {
    %c0_i32 = arith.constant 0 : i32
    %c0_i32_0 = arith.constant 0 : i32
    %c0_i32_1 = arith.constant 0 : i32
    return %c0_i32, %c0_i32_0 : i32, i32
  }
  func.func @transform_3(%arg0: i32) -> (i32, i32) {
    %c0_i32 = arith.constant 0 : i32
    %c0_i32_0 = arith.constant 0 : i32
    %c0_i32_1 = arith.constant 0 : i32
    return %c0_i32, %c0_i32_0 : i32, i32
  }
  func.func @transform_4(%arg0: i32) -> (i32, i32) {
    %c0_i32 = arith.constant 0 : i32
    %c0_i32_0 = arith.constant 0 : i32
    %c0_i32_1 = arith.constant 0 : i32
    return %c0_i32, %c0_i32_0 : i32, i32
  }
  func.func @transform_5(%arg0: i32) -> (i32, i32) {
    %c0_i32 = arith.constant 0 : i32
    %c0_i32_0 = arith.constant 0 : i32
    %c0_i32_1 = arith.constant 0 : i32
    return %c0_i32, %c0_i32_0 : i32, i32
  }
  func.func @transform_6(%arg0: i32) -> (i32, i32) {
    %c0_i32 = arith.constant 0 : i32
    %c0_i32_0 = arith.constant 0 : i32
    %c0_i32_1 = arith.constant 0 : i32
    return %c0_i32, %c0_i32_0 : i32, i32
  }
  func.func @transform_7(%arg0: i32) -> (i32, i32) {
    %c0_i32 = arith.constant 0 : i32
    %c0_i32_0 = arith.constant 0 : i32
    %c0_i32_1 = arith.constant 0 : i32
    return %c0_i32, %c0_i32_0 : i32, i32
  }
  func.func @transform_8(%arg0: i32) -> (i32, i32) {
    %c0_i32 = arith.constant 0 : i32
    %c0_i32_0 = arith.constant 0 : i32
    %c0_i32_1 = arith.constant 0 : i32
    return %c0_i32, %c0_i32_0 : i32, i32
  }
  func.func @transform_9(%arg0: i32) -> (i32, i32) {
    %c0_i32 = arith.constant 0 : i32
    %c0_i32_0 = arith.constant 0 : i32
    return %arg0, %c0_i32 : i32, i32
  }
}

</mosaic_0001>

<bundles_post_ra>
// kernel: tpu_custom_call.1
= control target key start
LH: loop header
LB: loop body
LE: loop exit
PB: predicated region body
PF: predicated region fallthrough
CT: control target
= control target key end

     0   :  { %14 = vsyncpa [#allocation3], 0  ;;  %s1337_s0 = inlined_call_operand.hbm [shape: f32[2,8,32], index: 0, kind: input, shape index: {}]   ;;  %s1338_s1 = inlined_call_operand.vmem [shape: f32[1,32], index: 1, kind: input, shape index: {}]   ;;  %s1339_s2 = inlined_call_operand.vmem [shape: f32[8,32], index: 2, kind: input, shape index: {}]   ;;  %s1340_s3 = inlined_call_operand.vmem [shape: f32[32,96], index: 3, kind: input, shape index: {}]   ;;  %s1341_s4 = inlined_call_operand.vmem [shape: f32[1,96], index: 4, kind: input, shape index: {}]   ;;  %s1342_s5 = inlined_call_operand.hbm [shape: f32[32,32], index: 5, kind: input, shape index: {}]   ;;  %s1343_s6 = inlined_call_operand.vmem [shape: f32[1,32], index: 6, kind: input, shape index: {}]   ;;  %s1344_s7 = inlined_call_operand.vmem [shape: f32[32,4], index: 7, kind: input, shape index: {}]   ;;  %s1345_s8 = inlined_call_operand.vmem [shape: f32[4,32], index: 8, kind: input, shape index: {}]   ;;  %s1346_s9 = inlined_call_operand.hbm [shape: f32[2,32], index: 9, kind: output, shape index: {}]  }
   0x1   :  { %15 = vsyncpa [#allocation6], 0 }
   0x2   :  { %16 = vsyncpa [#allocation4], 0  ;;  %s1150_s30 = smov [#allocation2]   ;;  %s1078_s13 = scalar_lea.hbm %s1337_s0, 256 }
   0x3   :  { %s22_s10 = sshll.u32 %s1150_s30, 4  ;;  %p1079_p0 = scmp.ne.s32.totalorder %s1337_s0, %s1078_s13  ;;  %s23_s10 = int_to_ptr.vmem [resolvable:$true] %s22_s10 }
   0x4   :  { %p1082_p1 = scmp.lt.u32.totalorder %s1078_s13, %s1337_s0 }
   0x6   :  { %p1084_p2 = pnand %p1082_p1, %p1079_p0 }
   0x8   :  { %1087 = shalt.err (!%p1084_p2)
}
   0x9   :  { %s1088_s18 = scalar_lea.vmem %s23_s10, 256  ;;  %p1093_p4 = scmp.lt.s32.totalorder %s23_s10, %s23_s10 }
   0xa   :  { %p1089_p3 = scmp.ne.s32.totalorder %s23_s10, %s1088_s18  ;;  %p1094_p5 = scmp.lt.s32.totalorder %s1088_s18, %s1088_s18 }
   0xc   :  { %p1095_p6 = por %p1094_p5, %p1093_p4 }
   0xe   :  { %p1096_p7 = pnand %p1095_p6, %p1089_p3 }
  0x10   :  { %1099 = shalt.err (!%p1096_p7)
}
  0x11   :  { %s1151_s19 = smov 128   ;;  %s1152_s20 = smov 8  }
  0x12   :  { %28 = dma.hbm_to_vmem [thread:$0]  %s1337_s0, 256, %s23_s10, [#allocation3], %s1151_s19, %s1151_s19, %s1152_s20  }
  0x13   :  { %s1153_s23 = smov [#allocation5]   ;;  %s1100_s27 = scalar_lea.hbm %s1342_s5, 512 }
  0x14   :  { %s42_s24 = sshll.u32 %s1153_s23, 4  ;;  %p1101_p8 = scmp.ne.s32.totalorder %s1342_s5, %s1100_s27  ;;  %s43_s24 = int_to_ptr.vmem [resolvable:$true] %s42_s24 }
  0x15   :  { %p1104_p9 = scmp.lt.u32.totalorder %s1100_s27, %s1342_s5 }
  0x17   :  { %p1106_p10 = pnand %p1104_p9, %p1101_p8 }
  0x19   :  { %1109 = shalt.err (!%p1106_p10)
}
  0x1a   :  { %s1110_s12 = scalar_lea.vmem %s43_s24, 512  ;;  %p1115_p12 = scmp.lt.s32.totalorder %s43_s24, %s43_s24 }
  0x1b   :  { %p1111_p11 = scmp.ne.s32.totalorder %s43_s24, %s1110_s12  ;;  %p1116_p13 = scmp.lt.s32.totalorder %s1110_s12, %s1110_s12 }
  0x1d   :  { %p1117_p0 = por %p1116_p13, %p1115_p12 }
  0x1f   :  { %p1118_p1 = pnand %p1117_p0, %p1111_p11 }
  0x21   :  { %1121 = shalt.err (!%p1118_p1)
}
  0x22   :  { %48 = dma.hbm_to_vmem [thread:$0]  %s1342_s5, 512, %s43_s24, [#allocation6], %s1151_s19, %s1151_s19, %s1152_s20  }
  0x23   :  { %1144 = dma.done.wait [#allocation3], 256  }
  0x24   :  { %1145 = vsyncadd [#allocation3], 4294967040 }
  0x25   :  { %1146 = dma.done.wait [#allocation6], 512  }
  0x26   :  { %1147 = vsyncadd [#allocation6], 4294966784  ;;  %v1154_v0 = vmov 0.0|0.0   ;;  %vm1155_vm0 = vmmov 0   ;;  %v1156_v1 = vmov 0.0   ;;  %vm63_vm1 = vcmask 261120  }
  0x27   :  { %1025 = vmatprep.subr.bf16.mxu0 %v1154_v0  ;;  %963 = vmatprep.mubr.msk.f32.mxu0 %vm1155_vm0, %v1156_v1  ;;  %v93_v2 = vld [vmem:[%s1340_s3] sm:$0xff]  ;;  %v94_v3 = vld [vmem:[%s1340_s3 + $0x8] sm:$0xff]  ;;  %v95_v4 = vld [vmem:[%s1340_s3 + $0x10] sm:$0xff]  ;;  %vm107_vm2 = vcmask 1041409   ;;  %v1158_v45 = vmov 1966171168   ;;  %v352_v47 = vlaneseq }
  0x28   :  { %v1026_v5 = vpack.c.bf16 %v94_v3, %v93_v2  ;;  %v96_v6 = vld [vmem:[%s1340_s3 + $0x18] sm:$0xff]  ;;  %v61_v7 = vld [vmem:[#allocation2] sm:$0xff]  ;;  %v62_v8 = vld [vmem:[#allocation2 + $0x8] sm:$0xff]  ;;  %v350_v46 = vunpack.c.l.s4 %v1158_v45  ;;  %vm542_vm3 = vcmask 1043456   ;;  %vm476_vm4 = vcmask 31744   ;;  %s1160_s10 = smov [#allocation7]  }
  0x29   :  { %v1029_v9 = vpack.c.bf16 %v96_v6, %v95_v4  ;;  %v64_v10 = vsel %vm63_vm1, %v61_v7, 0.0  ;;  %v71_v11 = vsel %vm63_vm1, %v62_v8, 0.0  ;;  %v90_v12 = vld [vmem:[%s1339_s2] sm:$0xff]  ;;  %v264_v40 = vld [vmem:[%s1344_s7 + $0x8] sm:$0xff]  ;;  %v353_v49 = vshrl.u32 %v352_v47, 7  ;;  %v265_v52 = vld [vmem:[%s1344_s7 + $0x10] sm:$0xff] }
  0x2a   :  { %1032 = vmatprep.subr.bf16.mxu1 %v1026_v5  ;;  %v65_v13 = vrot.slane %v64_v10, 4  ;;  %v72_v14 = vrot.slane %v71_v11, 4  ;;  %v91_v15 = vadd.f32 %v90_v12, %v61_v7  ;;  %1027 = vmatpush3.bf16.msra.mxu0 %v1026_v5  ;;  %v92_v20 = vadd.f32 %v90_v12, %v62_v8  ;;  %v904_v27 = vld [vmem:[%s1338_s1] ss:$0 sm:$0xff]  ;;  %s1157_s1 = smov 64   ;;  %v266_v53 = vld [vmem:[%s1344_s7 + $0x18] sm:$0xff] }
  0x2b   :  { %1034 = vmatpush3.bf16.msra.mxu1 %v1026_v5  ;;  %1028 = vmatprep.subr.bf16.mxu0 %v1154_v0  ;;  %v905_v34 = vld [vmem:[%s1341_s4] ss:$0 sm:$0xff]  ;;  %v351_v48 = vunpack.c.0.s8 %v350_v46  ;;  %v1043_v54 = vpack.c.bf16 %v266_v53, %v265_v52  ;;  %v373_v56 = vsub.s32 0, %v353_v49  ;;  %s894_s13 = sshll.u32 %s1160_s10, 4  ;;  %vm886_vm5 = vcmask 254976   ;;  %s895_s13 = int_to_ptr.vmem [resolvable:$true] %s894_s13 }
  0x2c   :  { %1036 = vmatprep.subr.bf16.mxu1 %v1029_v9  ;;  %v66_v16 = vadd.f32 %v65_v13, %v64_v10  ;;  %v73_v17 = vadd.f32 %v72_v14, %v71_v11  ;;  %974 = vmatprep.mubr.msk.f32.mxu1 %vm63_vm1, %v91_v15  ;;  %v263_v39 = vld [vmem:[%s1344_s7] sm:$0xff]  ;;  %s1159_s7 = smov 96   ;;  %s1122_s14 = scalar_lea.vmem %s895_s13, 32 }
  0x2d   :  { %v1040_v41 = vpack.c.bf16 %v264_v40, %v263_v39  ;;  %v354_v51 = vsub.s32 %v351_v48, %v353_v49  ;;  %p1123_p2 = scmp.ne.s32.totalorder %s895_s13, %s1122_s14  ;;  %p1127_p3 = scmp.lt.s32.totalorder %s895_s13, %s895_s13 }
  0x2e   :  { %v67_v18 = vrot.slane %v66_v16, 2  ;;  %v74_v19 = vrot.slane %v73_v17, 2  ;;  %1030 = vmatpush3.bf16.msra.mxu0 %v1029_v9  ;;  %p1128_p4 = scmp.lt.s32.totalorder %s1122_s14, %s1122_s14 }
  0x2f   :  { %1038 = vmatpush3.bf16.msra.mxu1 %v1029_v9  ;;  %1039 = vmatprep.subr.bf16.mxu0 %v1154_v0  ;;  %v267_v9 = vld [vmem:[%s1345_s8] sm:$0xf] }
  0x30   :  { %v68_v21 = vadd.f32 %v67_v18, %v66_v16  ;;  %v75_v22 = vadd.f32 %v74_v19, %v73_v17  ;;  %1046 = vmatprep.subr.bf16.mxu1 %v1040_v41  ;;  %p1129_p5 = por %p1128_p4, %p1127_p3 }
  0x32   :  { %v69_v23 = vrot.slane %v68_v21, 1  ;;  %v76_v24 = vrot.slane %v75_v22, 1  ;;  %975 = vmatmul.mubr.msk.f32.vlgmr.msra.gmra.mrb[0].mxu1 %vm63_vm1, %v92_v20  ;;  %p1130_p6 = pnand %p1129_p5, %p1123_p2 }
  0x33   :  { %1048 = vmatpush3.bf16.msra.mxu1 %v1040_v41 }
  0x34   :  { %v70_v25 = vadd.f32 %v69_v23, %v68_v21  ;;  %v77_v26 = vadd.f32 %v76_v24, %v75_v22  ;;  %1050 = vmatprep.subr.bf16.mxu1 %v1043_v54 }
  0x36   :  { %v79_v28 = vmul.f32 0.125, %v70_v25  ;;  %v80_v29 = vmul.f32 0.125, %v77_v26 }
  0x37   :  { %1052 = vmatpush3.bf16.msra.mxu1 %v1043_v54 }
  0x38   :  { %v88_v30 = vadd.f32 %v904_v27, %v79_v28  ;;  %v89_v31 = vadd.f32 %v904_v27, %v80_v29  ;;  %1004 = vmatprep.subr.msk.mxu1 %vm542_vm3, %v267_v9 }
  0x3a   :  { %v106_v32 = vrot.slane %v89_v31, 7 }
  0x3c   :  { %v108_v33 = vsel %vm107_vm2, %v106_v32, %v88_v30 }
  0x3d   :  { %964 = vmatmul.mubr.msk.f32.vlgmr.msra.gmra.mrb[0].mxu0 %vm63_vm1, %v108_v33 }
  0x3e   :  { %985 = vmatprep.mubr.msk.f32.mxu0 %vm1155_vm0, %v1156_v1  ;;  %1041 = vmatpush3.bf16.msra.mxu0 %v1040_v41 }
  0x3f   :  { %1042 = vmatprep.subr.bf16.mxu0 %v1154_v0 }
  0x42   :  { %1044 = vmatpush3.bf16.msra.mxu0 %v1043_v54 }
  0x43   :  { %999 = vmatprep.subr.mxu0 %v1156_v1 }
 0x105   :  { %v976_v35 = vpop.f32.mrb[0].mxu1 }
 0x106   :  { %v254_v36 = vpop.f32.mrb[1].mxu1  ;;  %v260_v38 = vadd.f32 %v976_v35, %v905_v34 }
 0x107   :  { %v255_v37 = vadd.f32 %v905_v34, %v254_v36 }
 0x109   :  { %383 = vrot.lane.b32.xlu0 %v255_v37, %s1157_s1 }
 0x10d   :  { %385 = vrot.lane.b32.xlu0 %v260_v38, %s1157_s1 }
 0x110   :  { %v177_v42 = vpop.f32.mrb[0].mxu0 }
 0x111   :  { %v178_v43 = vadd.f32 %v905_v34, %v177_v42  ;;  %v965_v44 = vpop.f32.mrb[1].mxu0 }
 0x113   :  { %269 = vrot.lane.b32.xlu1 %v178_v43, %s1157_s1  ;;  %v181_v50 = vmul.f32 0.35355338, %v178_v43 }
 0x115   :  { %v355_v55 = vrot.slane %v181_v50, %v354_v51 }
 0x117   :  { %v363_v57 = vrot.slane %v355_v55, %v354_v51  ;;  %v356_v58 = vcombine.high %v355_v55, %v355_v55 }
 0x119   :  { %v374_v59 = vrot.slane %v363_v57, %v373_v56  ;;  %v370_v60 = vrot.slane %v356_v58, %v354_v51 }
 0x11b   :  { %v378_v63 = vrot.slane %v370_v60, %v373_v56 }
 0x17b   :  { %v384_v61 = vpop.permute.xlu0 %383 }
 0x17c   :  { %v389_v62 = vmul.f32 %v384_v61, %v374_v59  ;;  %v802_v61 = vld [vmem:[#allocation5] sm:$0xff] }
 0x17e   :  { %393 = vrot.lane.b32.xlu1 %v389_v62, %s1157_s1  ;;  %v803_v62 = vld [vmem:[#allocation5 + $0x8] sm:$0xff] }
 0x17f   :  { %v386_v2 = vpop.permute.xlu0 %385 }
 0x180   :  { %v390_v3 = vmul.f32 %v386_v2, %v378_v63  ;;  %v1054_v63 = vpack.c.bf16 %v803_v62, %v802_v61  ;;  %v805_v2 = vld [vmem:[#allocation5 + $0x18] sm:$0xff] }
 0x182   :  { %395 = vrot.lane.b32.xlu0 %v390_v3, %s1157_s1 }
 0x185   :  { %v270_v4 = vpop.permute.xlu1 %269 }
 0x186   :  { %v272_v5 = vmul.f32 %v270_v4, %v181_v50  ;;  %774 = vrot.lane.b32.xlu0 %v255_v37, %s1159_s7 }
 0x188   :  { %274 = vrot.lane.b32.xlu1 %v272_v5, %s1157_s1 }
 0x18a   :  { %770 = vrot.lane.b32.xlu0 %v178_v43, %s1159_s7 }
 0x18c   :  { %776 = vrot.lane.b32.xlu1 %v260_v38, %s1159_s7 }
 0x1f0   :  { %v394_v6 = vpop.permute.xlu1 %393 }
 0x1f1   :  { %996 = vmatprep.mubr.msk.f32.mxu1 %vm63_vm1, %v394_v6 }
 0x1f4   :  { %v396_v7 = vpop.permute.xlu0 %395 }
 0x1f5   :  { %997 = vmatmul.mubr.msk.f32.vlgmr.msra.gmra.mrb[2].mxu1 %vm63_vm1, %v396_v7 }
 0x1f6   :  { %1005 = vmatpush3.msk.msra.mxu1 %vm542_vm3, %v267_v9 }
 0x1f7   :  { %1053 = vmatprep.subr.bf16.mxu1 %v1154_v0 }
 0x1fa   :  { %v275_v8 = vpop.permute.xlu1 %274 }
 0x1fb   :  { %986 = vmatmul.mubr.msk.f32.vlgmr.msra.gmra.mrb[2].mxu0 %vm63_vm1, %v275_v8  ;;  %v775_v8 = vpop.permute.xlu0 %774 }
 0x1fc   :  { %1001 = vmatprep.mubr.msk.f32.mxu0 %vm1155_vm0, %v1156_v1  ;;  %1000 = vmatpush3.msk.msra.mxu0 %vm542_vm3, %v267_v9 }
 0x1fd   :  { %1009 = vmatprep.subr.mxu0 %v1156_v1 }
 0x1fe   :  { %v777_v6 = vpop.permute.xlu1 %776 }
 0x2c8   :  { %v998_v10 = vpop.f32.mrb[2].mxu1 }
 0x2c9   :  { %v484_v11 = vsel %vm476_vm4, %v998_v10, -inf  ;;  %v467_v12 = vpop.f32.mrb[3].mxu1 }
 0x2ca   :  { %v485_v13 = vrot.slane %v484_v11, 4  ;;  %v477_v14 = vsel %vm476_vm4, %v467_v12, -inf }
 0x2cb   :  { %v478_v15 = vrot.slane %v477_v14, 4 }
 0x2cc   :  { %v486_v16 = vmax.f32 %v484_v11, %v485_v13 }
 0x2cd   :  { %v479_v17 = vmax.f32 %v477_v14, %v478_v15 }
 0x2ce   :  { %v487_v18 = vrot.slane %v486_v16, 2  ;;  %v344_v19 = vpop.f32.mrb[2].mxu0 }
 0x2cf   :  { %v480_v20 = vrot.slane %v479_v17, 2  ;;  %v987_v21 = vpop.f32.mrb[3].mxu0  ;;  %v492_v27 = vrot.slane %v344_v19, 1 }
 0x2d0   :  { %v488_v22 = vmax.f32 %v486_v16, %v487_v18 }
 0x2d1   :  { %v481_v23 = vmax.f32 %v479_v17, %v480_v20 }
 0x2d2   :  { %v489_v24 = vrot.slane %v488_v22, 1 }
 0x2d3   :  { %v482_v25 = vrot.slane %v481_v23, 1 }
 0x2d4   :  { %v490_v26 = vmax.f32 %v488_v22, %v489_v24  ;;  %v771_v24 = vpop.permute.xlu0 %770 }
 0x2d5   :  { %v483_v28 = vmax.f32 %v481_v23, %v482_v25 }
 0x2d6   :  { %v496_v29 = vmax.f32 %v490_v26, %v492_v27 }
 0x2d7   :  { %v495_v30 = vmax.f32 %v483_v28, %v344_v19 }
 0x2d8   :  { %v499_v31 = vrot.slane %v496_v29, 7  ;;  %v512_v32 = vrot.slane %v496_v29, %v373_v56 }
 0x2d9   :  { %v508_v33 = vrot.slane %v495_v30, %v373_v56 }
 0x2da   :  { %v500_v34 = vsel %vm107_vm2, %v499_v31, %v495_v30  ;;  %v514_v35 = vsub.f32 %v998_v10, %v512_v32  ;;  %v919_v32 = vld [vmem:[%s1343_s6] ss:$0 sm:$0xff] }
 0x2db   :  { %v502_v36 = vsub.f32 %v344_v19, %v500_v34  ;;  %v513_v37 = vsub.f32 %v467_v12, %v508_v33 }
 0x2dc   :  { %v517_v38 = vmul.f32 1.442695, %v514_v35 }
 0x2dd   :  { %v503_v39 = vmul.f32 1.442695, %v502_v36  ;;  %v515_v40 = vmul.f32 1.442695, %v513_v37 }
 0x2de   :  { %1070 = vpow2.f32 %v517_v38 }
 0x2df   :  { %1072 = vpow2.f32 %v503_v39 }
 0x2e0   :  { %1074 = vpow2.f32 %v515_v40 }
 0x2e8   :  { %v1071_v41 = vpop.eup %1070 }
 0x2e9   :  { %v1073_v42 = vpop.eup %1072  ;;  %v526_v43 = vsel %vm476_vm4, %v1071_v41, 0.0 }
 0x2ea   :  { %v1075_v44 = vpop.eup %1074  ;;  %v527_v45 = vrot.slane %v526_v43, 4  ;;  %1002 = vmatmul.mubr.msk.f32.vlgmr.msra.gmra.mrb[4].mxu0 %vm476_vm4, %v1073_v42 }
 0x2eb   :  { %v519_v46 = vsel %vm476_vm4, %v1075_v44, 0.0  ;;  %1006 = vmatprep.mubr.msk.f32.mxu1 %vm476_vm4, %v1075_v44  ;;  %1010 = vmatpush3.msk.msra.mxu0 %vm542_vm3, %v267_v9 }
 0x2ec   :  { %v520_v47 = vrot.slane %v519_v46, 4  ;;  %v528_v48 = vadd.f32 %v527_v45, %v526_v43  ;;  %1007 = vmatmul.mubr.msk.f32.vlgmr.msra.gmra.mrb[4].mxu1 %vm476_vm4, %v1071_v41  ;;  %1011 = vmatprep.mubr.msk.f32.mxu0 %vm1155_vm0, %v1156_v1 }
 0x2ed   :  { %1022 = vmatprep.mubr.msk.f32.mxu1 %vm1155_vm0, %v1156_v1  ;;  %1055 = vmatpush3.bf16.msra.mxu1 %v1054_v63  ;;  %v804_v1 = vld [vmem:[#allocation5 + $0x10] sm:$0xff] }
 0x2ee   :  { %v521_v49 = vadd.f32 %v520_v47, %v519_v46  ;;  %v529_v50 = vrot.slane %v528_v48, 2  ;;  %1056 = vmatprep.subr.bf16.mxu1 %v1154_v0  ;;  %v1057_v3 = vpack.c.bf16 %v805_v2, %v804_v1 }
 0x2f0   :  { %v522_v51 = vrot.slane %v521_v49, 2  ;;  %v530_v52 = vadd.f32 %v529_v50, %v528_v48 }
 0x2f1   :  { %1058 = vmatpush3.bf16.msra.mxu1 %v1057_v3 }
 0x2f2   :  { %v523_v53 = vadd.f32 %v522_v51, %v521_v49  ;;  %v531_v54 = vrot.slane %v530_v52, 1 }
 0x2f4   :  { %v524_v55 = vrot.slane %v523_v53, 1  ;;  %v532_v56 = vadd.f32 %v531_v54, %v530_v52 }
 0x2f6   :  { %v525_v57 = vadd.f32 %v524_v55, %v523_v53 }
 0x2f8   :  { %v535_v58 = vsel %vm107_vm2, %v532_v56, %v525_v57 }
 0x2f9   :  { %v537_v59 = vadd.f32 %v1073_v42, %v535_v58 }
 0x2fb   :  { %1076 = vrcp.f32 %v537_v59 }
 0x305   :  { %v1077_v60 = vpop.eup %1076 }
 0x306   :  { %1012 = vmatmul.mubr.msk.f32.vlgmr.msra.gmra.mrb[6].mxu0 %vm476_vm4, %v1077_v60 }
 0x3bd   :  { %v612_v4 = vpop.f32.mrb[4].mxu0 }
 0x3be   :  { %v1003_v5 = vpop.f32.mrb[5].mxu0  ;;  %v773_v26 = vmul.f32 %v771_v24, %v612_v4 }
 0x3bf   :  { %v1008_v7 = vpop.f32.mrb[4].mxu1 }
 0x3c0   :  { %v781_v9 = vmul.f32 %v1008_v7, %v777_v6  ;;  %v688_v10 = vpop.f32.mrb[5].mxu1 }
 0x3c1   :  { %v780_v11 = vmul.f32 %v775_v8, %v688_v10 }
 0x3c2   :  { %v789_v12 = vsel %vm63_vm1, %v781_v9, 0.0 }
 0x3c3   :  { %v790_v13 = vrot.slane %v789_v12, 4  ;;  %v782_v14 = vsel %vm63_vm1, %v780_v11, 0.0 }
 0x3c4   :  { %v783_v15 = vrot.slane %v782_v14, 4 }
 0x3c5   :  { %v791_v16 = vadd.f32 %v790_v13, %v789_v12 }
 0x3c6   :  { %v784_v0 = vadd.f32 %v783_v15, %v782_v14 }
 0x3c7   :  { %v792_v17 = vrot.slane %v791_v16, 2 }
 0x3c8   :  { %v785_v18 = vrot.slane %v784_v0, 2 }
 0x3c9   :  { %v793_v19 = vadd.f32 %v792_v17, %v791_v16 }
 0x3ca   :  { %v786_v20 = vadd.f32 %v785_v18, %v784_v0 }
 0x3cb   :  { %v794_v21 = vrot.slane %v793_v19, 1 }
 0x3cc   :  { %v787_v22 = vrot.slane %v786_v20, 1 }
 0x3cd   :  { %v795_v23 = vadd.f32 %v794_v21, %v793_v19 }
 0x3ce   :  { %v788_v25 = vadd.f32 %v787_v22, %v786_v20 }
 0x3d0   :  { %v798_v27 = vsel %vm107_vm2, %v795_v23, %v788_v25 }
 0x3d1   :  { %v800_v28 = vadd.f32 %v798_v27, %v773_v26 }
 0x3d9   :  { %v766_v29 = vpop.f32.mrb[6].mxu0 }
 0x3da   :  { %v801_v30 = vmul.f32 %v800_v28, %v766_v29  ;;  %v1013_v31 = vpop.f32.mrb[7].mxu0 }
 0x3dc   :  { %1023 = vmatmul.mubr.msk.f32.vlgmr.msra.gmra.mrb[6].mxu1 %vm63_vm1, %v801_v30 }
 0x4af   :  { %v882_v33 = vpop.f32.mrb[6].mxu1 }
 0x4b0   :  { %v883_v34 = vadd.f32 %v919_v32, %v882_v33  ;;  %v1024_v35 = vpop.f32.mrb[7].mxu1 }
 0x4b2   :  { %887 = vst.msk [vmem:[#allocation7] sm:$0x3] %vm886_vm5, %v883_v34 }
 0x4b3   :  { %1133 = shalt.err (!%p1130_p6)
}
 0x4b4   :  { %s1134_s5 = scalar_lea.hbm %s1346_s9, 32 }
 0x4b5   :  { %p1135_p7 = scmp.ne.s32.totalorder %s1346_s9, %s1134_s5  ;;  %p1138_p8 = scmp.lt.u32.totalorder %s1134_s5, %s1346_s9 }
 0x4b7   :  { %p1140_p9 = pnand %p1138_p8, %p1135_p7 }
 0x4b9   :  { %1143 = shalt.err (!%p1140_p9)
}
 0x4ba   :  { %897 = dma.vmem_to_hbm [thread:$0]  %s895_s13, 32, %s1346_s9, [#allocation4]  }
 0x4bb   :  { %1148 = dma.done.wait [#allocation4], 32  }
 0x4bc   :  { %1149 = vsyncadd [#allocation4], 4294967264 }
 0x4bd   :  { %901 = vsyncpa [#allocation3], 1 }
 0x4be   :  { %902 = vsyncpa [#allocation6], 1 }
 0x4bf   :  { %903 = vsyncpa [#allocation4], 1 }

// kernel: tpu_custom_call.1
= control target key start
LH: loop header
LB: loop body
LE: loop exit
PB: predicated region body
PF: predicated region fallthrough
CT: control target
= control target key end

     0   :  { %14 = vsyncpa [#allocation3], 0  ;;  %s1337_s0 = inlined_call_operand.hbm [shape: f32[2,8,32], index: 0, kind: input, shape index: {}]   ;;  %s1338_s1 = inlined_call_operand.vmem [shape: f32[1,32], index: 1, kind: input, shape index: {}]   ;;  %s1339_s2 = inlined_call_operand.vmem [shape: f32[8,32], index: 2, kind: input, shape index: {}]   ;;  %s1340_s3 = inlined_call_operand.vmem [shape: f32[32,96], index: 3, kind: input, shape index: {}]   ;;  %s1341_s4 = inlined_call_operand.vmem [shape: f32[1,96], index: 4, kind: input, shape index: {}]   ;;  %s1342_s5 = inlined_call_operand.hbm [shape: f32[32,32], index: 5, kind: input, shape index: {}]   ;;  %s1343_s6 = inlined_call_operand.vmem [shape: f32[1,32], index: 6, kind: input, shape index: {}]   ;;  %s1344_s7 = inlined_call_operand.vmem [shape: f32[32,4], index: 7, kind: input, shape index: {}]   ;;  %s1345_s8 = inlined_call_operand.vmem [shape: f32[4,32], index: 8, kind: input, shape index: {}]   ;;  %s1346_s9 = inlined_call_operand.hbm [shape: f32[2,32], index: 9, kind: output, shape index: {}]  }
   0x1   :  { %15 = vsyncpa [#allocation6], 0 }
   0x2   :  { %16 = vsyncpa [#allocation4], 0  ;;  %s1150_s30 = smov [#allocation2]   ;;  %s1078_s13 = scalar_lea.hbm %s1337_s0, 256 }
   0x3   :  { %s22_s10 = sshll.u32 %s1150_s30, 4  ;;  %p1079_p0 = scmp.ne.s32.totalorder %s1337_s0, %s1078_s13  ;;  %s23_s10 = int_to_ptr.vmem [resolvable:$true] %s22_s10 }
   0x4   :  { %p1082_p1 = scmp.lt.u32.totalorder %s1078_s13, %s1337_s0 }
   0x6   :  { %p1084_p2 = pnand %p1082_p1, %p1079_p0 }
   0x8   :  { %1087 = shalt.err (!%p1084_p2)
}
   0x9   :  { %s1088_s18 = scalar_lea.vmem %s23_s10, 256  ;;  %p1093_p4 = scmp.lt.s32.totalorder %s23_s10, %s23_s10 }
   0xa   :  { %p1089_p3 = scmp.ne.s32.totalorder %s23_s10, %s1088_s18  ;;  %p1094_p5 = scmp.lt.s32.totalorder %s1088_s18, %s1088_s18 }
   0xc   :  { %p1095_p6 = por %p1094_p5, %p1093_p4 }
   0xe   :  { %p1096_p7 = pnand %p1095_p6, %p1089_p3 }
  0x10   :  { %1099 = shalt.err (!%p1096_p7)
}
  0x11   :  { %s1151_s19 = smov 128   ;;  %s1152_s20 = smov 8  }
  0x12   :  { %28 = dma.hbm_to_vmem [thread:$0]  %s1337_s0, 256, %s23_s10, [#allocation3], %s1151_s19, %s1151_s19, %s1152_s20  }
  0x13   :  { %s1153_s23 = smov [#allocation5]   ;;  %s1100_s27 = scalar_lea.hbm %s1342_s5, 512 }
  0x14   :  { %s42_s24 = sshll.u32 %s1153_s23, 4  ;;  %p1101_p8 = scmp.ne.s32.totalorder %s1342_s5, %s1100_s27  ;;  %s43_s24 = int_to_ptr.vmem [resolvable:$true] %s42_s24 }
  0x15   :  { %p1104_p9 = scmp.lt.u32.totalorder %s1100_s27, %s1342_s5 }
  0x17   :  { %p1106_p10 = pnand %p1104_p9, %p1101_p8 }
  0x19   :  { %1109 = shalt.err (!%p1106_p10)
}
  0x1a   :  { %s1110_s12 = scalar_lea.vmem %s43_s24, 512  ;;  %p1115_p12 = scmp.lt.s32.totalorder %s43_s24, %s43_s24 }
  0x1b   :  { %p1111_p11 = scmp.ne.s32.totalorder %s43_s24, %s1110_s12  ;;  %p1116_p13 = scmp.lt.s32.totalorder %s1110_s12, %s1110_s12 }
  0x1d   :  { %p1117_p0 = por %p1116_p13, %p1115_p12 }
  0x1f   :  { %p1118_p1 = pnand %p1117_p0, %p1111_p11 }
  0x21   :  { %1121 = shalt.err (!%p1118_p1)
}
  0x22   :  { %48 = dma.hbm_to_vmem [thread:$0]  %s1342_s5, 512, %s43_s24, [#allocation6], %s1151_s19, %s1151_s19, %s1152_s20  }
  0x23   :  { %1144 = dma.done.wait [#allocation3], 256  }
  0x24   :  { %1145 = vsyncadd [#allocation3], 4294967040 }
  0x25   :  { %1146 = dma.done.wait [#allocation6], 512  }
  0x26   :  { %1147 = vsyncadd [#allocation6], 4294966784  ;;  %v1154_v0 = vmov 0.0|0.0   ;;  %vm1155_vm0 = vmmov 0   ;;  %v1156_v1 = vmov 0.0   ;;  %vm63_vm1 = vcmask 261120  }
  0x27   :  { %1025 = vmatprep.subr.bf16.mxu0 %v1154_v0  ;;  %963 = vmatprep.mubr.msk.f32.mxu0 %vm1155_vm0, %v1156_v1  ;;  %v93_v2 = vld [vmem:[%s1340_s3] sm:$0xff]  ;;  %v94_v3 = vld [vmem:[%s1340_s3 + $0x8] sm:$0xff]  ;;  %v95_v4 = vld [vmem:[%s1340_s3 + $0x10] sm:$0xff]  ;;  %vm107_vm2 = vcmask 1041409   ;;  %v1158_v45 = vmov 1966171168   ;;  %v352_v47 = vlaneseq }
  0x28   :  { %v1026_v5 = vpack.c.bf16 %v94_v3, %v93_v2  ;;  %v96_v6 = vld [vmem:[%s1340_s3 + $0x18] sm:$0xff]  ;;  %v61_v7 = vld [vmem:[#allocation2] sm:$0xff]  ;;  %v62_v8 = vld [vmem:[#allocation2 + $0x8] sm:$0xff]  ;;  %v350_v46 = vunpack.c.l.s4 %v1158_v45  ;;  %vm542_vm3 = vcmask 1043456   ;;  %vm476_vm4 = vcmask 31744   ;;  %s1160_s10 = smov [#allocation7]  }
  0x29   :  { %v1029_v9 = vpack.c.bf16 %v96_v6, %v95_v4  ;;  %v64_v10 = vsel %vm63_vm1, %v61_v7, 0.0  ;;  %v71_v11 = vsel %vm63_vm1, %v62_v8, 0.0  ;;  %v90_v12 = vld [vmem:[%s1339_s2] sm:$0xff]  ;;  %v264_v40 = vld [vmem:[%s1344_s7 + $0x8] sm:$0xff]  ;;  %v353_v49 = vshrl.u32 %v352_v47, 7  ;;  %v265_v52 = vld [vmem:[%s1344_s7 + $0x10] sm:$0xff] }
  0x2a   :  { %1032 = vmatprep.subr.bf16.mxu1 %v1026_v5  ;;  %v65_v13 = vrot.slane %v64_v10, 4  ;;  %v72_v14 = vrot.slane %v71_v11, 4  ;;  %v91_v15 = vadd.f32 %v90_v12, %v61_v7  ;;  %1027 = vmatpush3.bf16.msra.mxu0 %v1026_v5  ;;  %v92_v20 = vadd.f32 %v90_v12, %v62_v8  ;;  %v904_v27 = vld [vmem:[%s1338_s1] ss:$0 sm:$0xff]  ;;  %s1157_s1 = smov 64   ;;  %v266_v53 = vld [vmem:[%s1344_s7 + $0x18] sm:$0xff] }
  0x2b   :  { %1034 = vmatpush3.bf16.msra.mxu1 %v1026_v5  ;;  %1028 = vmatprep.subr.bf16.mxu0 %v1154_v0  ;;  %v905_v34 = vld [vmem:[%s1341_s4] ss:$0 sm:$0xff]  ;;  %v351_v48 = vunpack.c.0.s8 %v350_v46  ;;  %v1043_v54 = vpack.c.bf16 %v266_v53, %v265_v52  ;;  %v373_v56 = vsub.s32 0, %v353_v49  ;;  %s894_s13 = sshll.u32 %s1160_s10, 4  ;;  %vm886_vm5 = vcmask 254976   ;;  %s895_s13 = int_to_ptr.vmem [resolvable:$true] %s894_s13 }
  0x2c   :  { %1036 = vmatprep.subr.bf16.mxu1 %v1029_v9  ;;  %v66_v16 = vadd.f32 %v65_v13, %v64_v10  ;;  %v73_v17 = vadd.f32 %v72_v14, %v71_v11  ;;  %974 = vmatprep.mubr.msk.f32.mxu1 %vm63_vm1, %v91_v15  ;;  %v263_v39 = vld [vmem:[%s1344_s7] sm:$0xff]  ;;  %s1159_s7 = smov 96   ;;  %s1122_s14 = scalar_lea.vmem %s895_s13, 32 }
  0x2d   :  { %v1040_v41 = vpack.c.bf16 %v264_v40, %v263_v39  ;;  %v354_v51 = vsub.s32 %v351_v48, %v353_v49  ;;  %p1123_p2 = scmp.ne.s32.totalorder %s895_s13, %s1122_s14  ;;  %p1127_p3 = scmp.lt.s32.totalorder %s895_s13, %s895_s13 }
  0x2e   :  { %v67_v18 = vrot.slane %v66_v16, 2  ;;  %v74_v19 = vrot.slane %v73_v17, 2  ;;  %1030 = vmatpush3.bf16.msra.mxu0 %v1029_v9  ;;  %p1128_p4 = scmp.lt.s32.totalorder %s1122_s14, %s1122_s14 }
  0x2f   :  { %1038 = vmatpush3.bf16.msra.mxu1 %v1029_v9  ;;  %1039 = vmatprep.subr.bf16.mxu0 %v1154_v0  ;;  %v267_v9 = vld [vmem:[%s1345_s8] sm:$0xf] }
  0x30   :  { %v68_v21 = vadd.f32 %v67_v18, %v66_v16  ;;  %v75_v22 = vadd.f32 %v74_v19, %v73_v17  ;;  %1046 = vmatprep.subr.bf16.mxu1 %v1040_v41  ;;  %p1129_p5 = por %p1128_p4, %p1127_p3 }
  0x32   :  { %v69_v23 = vrot.slane %v68_v21, 1  ;;  %v76_v24 = vrot.slane %v75_v22, 1  ;;  %975 = vmatmul.mubr.msk.f32.vlgmr.msra.gmra.mrb[0].mxu1 %vm63_vm1, %v92_v20  ;;  %p1130_p6 = pnand %p1129_p5, %p1123_p2 }
  0x33   :  { %1048 = vmatpush3.bf16.msra.mxu1 %v1040_v41 }
  0x34   :  { %v70_v25 = vadd.f32 %v69_v23, %v68_v21  ;;  %v77_v26 = vadd.f32 %v76_v24, %v75_v22  ;;  %1050 = vmatprep.subr.bf16.mxu1 %v1043_v54 }
  0x36   :  { %v79_v28 = vmul.f32 0.125, %v70_v25  ;;  %v80_v29 = vmul.f32 0.125, %v77_v26 }
  0x37   :  { %1052 = vmatpush3.bf16.msra.mxu1 %v1043_v54 }
  0x38   :  { %v88_v30 = vadd.f32 %v904_v27, %v79_v28  ;;  %v89_v31 = vadd.f32 %v904_v27, %v80_v29  ;;  %1004 = vmatprep.subr.msk.mxu1 %vm542_vm3, %v267_v9 }
  0x3a   :  { %v106_v32 = vrot.slane %v89_v31, 7 }
  0x3c   :  { %v108_v33 = vsel %vm107_vm2, %v106_v32, %v88_v30 }
  0x3d   :  { %964 = vmatmul.mubr.msk.f32.vlgmr.msra.gmra.mrb[0].mxu0 %vm63_vm1, %v108_v33 }
  0x3e   :  { %985 = vmatprep.mubr.msk.f32.mxu0 %vm1155_vm0, %v1156_v1  ;;  %1041 = vmatpush3.bf16.msra.mxu0 %v1040_v41 }
  0x3f   :  { %1042 = vmatprep.subr.bf16.mxu0 %v1154_v0 }
  0x42   :  { %1044 = vmatpush3.bf16.msra.mxu0 %v1043_v54 }
  0x43   :  { %999 = vmatprep.subr.mxu0 %v1156_v1 }
 0x105   :  { %v976_v35 = vpop.f32.mrb[0].mxu1 }
 0x106   :  { %v254_v36 = vpop.f32.mrb[1].mxu1  ;;  %v260_v38 = vadd.f32 %v976_v35, %v905_v34 }
 0x107   :  { %v255_v37 = vadd.f32 %v905_v34, %v254_v36 }
 0x109   :  { %383 = vrot.lane.b32.xlu0 %v255_v37, %s1157_s1 }
 0x10d   :  { %385 = vrot.lane.b32.xlu0 %v260_v38, %s1157_s1 }
 0x110   :  { %v177_v42 = vpop.f32.mrb[0].mxu0 }
 0x111   :  { %v178_v43 = vadd.f32 %v905_v34, %v177_v42  ;;  %v965_v44 = vpop.f32.mrb[1].mxu0 }
 0x113   :  { %269 = vrot.lane.b32.xlu1 %v178_v43, %s1157_s1  ;;  %v181_v50 = vmul.f32 0.35355338, %v178_v43 }
 0x115   :  { %v355_v55 = vrot.slane %v181_v50, %v354_v51 }
 0x117   :  { %v363_v57 = vrot.slane %v355_v55, %v354_v51  ;;  %v356_v58 = vcombine.high %v355_v55, %v355_v55 }
 0x119   :  { %v374_v59 = vrot.slane %v363_v57, %v373_v56  ;;  %v370_v60 = vrot.slane %v356_v58, %v354_v51 }
 0x11b   :  { %v378_v63 = vrot.slane %v370_v60, %v373_v56 }
 0x17b   :  { %v384_v61 = vpop.permute.xlu0 %383 }
 0x17c   :  { %v389_v62 = vmul.f32 %v384_v61, %v374_v59  ;;  %v802_v61 = vld [vmem:[#allocation5] sm:$0xff] }
 0x17e   :  { %393 = vrot.lane.b32.xlu1 %v389_v62, %s1157_s1  ;;  %v803_v62 = vld [vmem:[#allocation5 + $0x8] sm:$0xff] }
 0x17f   :  { %v386_v2 = vpop.permute.xlu0 %385 }
 0x180   :  { %v390_v3 = vmul.f32 %v386_v2, %v378_v63  ;;  %v1054_v63 = vpack.c.bf16 %v803_v62, %v802_v61  ;;  %v805_v2 = vld [vmem:[#allocation5 + $0x18] sm:$0xff] }
 0x182   :  { %395 = vrot.lane.b32.xlu0 %v390_v3, %s1157_s1 }
 0x185   :  { %v270_v4 = vpop.permute.xlu1 %269 }
 0x186   :  { %v272_v5 = vmul.f32 %v270_v4, %v181_v50  ;;  %774 = vrot.lane.b32.xlu0 %v255_v37, %s1159_s7 }
 0x188   :  { %274 = vrot.lane.b32.xlu1 %v272_v5, %s1157_s1 }
 0x18a   :  { %770 = vrot.lane.b32.xlu0 %v178_v43, %s1159_s7 }
 0x18c   :  { %776 = vrot.lane.b32.xlu1 %v260_v38, %s1159_s7 }
 0x1f0   :  { %v394_v6 = vpop.permute.xlu1 %393 }
 0x1f1   :  { %996 = vmatprep.mubr.msk.f32.mxu1 %vm63_vm1, %v394_v6 }
 0x1f4   :  { %v396_v7 = vpop.permute.xlu0 %395 }
 0x1f5   :  { %997 = vmatmul.mubr.msk.f32.vlgmr.msra.gmra.mrb[2].mxu1 %vm63_vm1, %v396_v7 }
 0x1f6   :  { %1005 = vmatpush3.msk.msra.mxu1 %vm542_vm3, %v267_v9 }
 0x1f7   :  { %1053 = vmatprep.subr.bf16.mxu1 %v1154_v0 }
 0x1fa   :  { %v275_v8 = vpop.permute.xlu1 %274 }
 0x1fb   :  { %986 = vmatmul.mubr.msk.f32.vlgmr.msra.gmra.mrb[2].mxu0 %vm63_vm1, %v275_v8  ;;  %v775_v8 = vpop.permute.xlu0 %774 }
 0x1fc   :  { %1001 = vmatprep.mubr.msk.f32.mxu0 %vm1155_vm0, %v1156_v1  ;;  %1000 = vmatpush3.msk.msra.mxu0 %vm542_vm3, %v267_v9 }
 0x1fd   :  { %1009 = vmatprep.subr.mxu0 %v1156_v1 }
 0x1fe   :  { %v777_v6 = vpop.permute.xlu1 %776 }
 0x2c8   :  { %v998_v10 = vpop.f32.mrb[2].mxu1 }
 0x2c9   :  { %v484_v11 = vsel %vm476_vm4, %v998_v10, -inf  ;;  %v467_v12 = vpop.f32.mrb[3].mxu1 }
 0x2ca   :  { %v485_v13 = vrot.slane %v484_v11, 4  ;;  %v477_v14 = vsel %vm476_vm4, %v467_v12, -inf }
 0x2cb   :  { %v478_v15 = vrot.slane %v477_v14, 4 }
 0x2cc   :  { %v486_v16 = vmax.f32 %v484_v11, %v485_v13 }
 0x2cd   :  { %v479_v17 = vmax.f32 %v477_v14, %v478_v15 }
 0x2ce   :  { %v487_v18 = vrot.slane %v486_v16, 2  ;;  %v344_v19 = vpop.f32.mrb[2].mxu0 }
 0x2cf   :  { %v480_v20 = vrot.slane %v479_v17, 2  ;;  %v987_v21 = vpop.f32.mrb[3].mxu0  ;;  %v492_v27 = vrot.slane %v344_v19, 1 }
 0x2d0   :  { %v488_v22 = vmax.f32 %v486_v16, %v487_v18 }
 0x2d1   :  { %v481_v23 = vmax.f32 %v479_v17, %v480_v20 }
 0x2d2   :  { %v489_v24 = vrot.slane %v488_v22, 1 }
 0x2d3   :  { %v482_v25 = vrot.slane %v481_v23, 1 }
 0x2d4   :  { %v490_v26 = vmax.f32 %v488_v22, %v489_v24  ;;  %v771_v24 = vpop.permute.xlu0 %770 }
 0x2d5   :  { %v483_v28 = vmax.f32 %v481_v23, %v482_v25 }
 0x2d6   :  { %v496_v29 = vmax.f32 %v490_v26, %v492_v27 }
 0x2d7   :  { %v495_v30 = vmax.f32 %v483_v28, %v344_v19 }
 0x2d8   :  { %v499_v31 = vrot.slane %v496_v29, 7  ;;  %v512_v32 = vrot.slane %v496_v29, %v373_v56 }
 0x2d9   :  { %v508_v33 = vrot.slane %v495_v30, %v373_v56 }
 0x2da   :  { %v500_v34 = vsel %vm107_vm2, %v499_v31, %v495_v30  ;;  %v514_v35 = vsub.f32 %v998_v10, %v512_v32  ;;  %v919_v32 = vld [vmem:[%s1343_s6] ss:$0 sm:$0xff] }
 0x2db   :  { %v502_v36 = vsub.f32 %v344_v19, %v500_v34  ;;  %v513_v37 = vsub.f32 %v467_v12, %v508_v33 }
 0x2dc   :  { %v517_v38 = vmul.f32 1.442695, %v514_v35 }
 0x2dd   :  { %v503_v39 = vmul.f32 1.442695, %v502_v36  ;;  %v515_v40 = vmul.f32 1.442695, %v513_v37 }
 0x2de   :  { %1070 = vpow2.f32 %v517_v38 }
 0x2df   :  { %1072 = vpow2.f32 %v503_v39 }
 0x2e0   :  { %1074 = vpow2.f32 %v515_v40 }
 0x2e8   :  { %v1071_v41 = vpop.eup %1070 }
 0x2e9   :  { %v1073_v42 = vpop.eup %1072  ;;  %v526_v43 = vsel %vm476_vm4, %v1071_v41, 0.0 }
 0x2ea   :  { %v1075_v44 = vpop.eup %1074  ;;  %v527_v45 = vrot.slane %v526_v43, 4  ;;  %1002 = vmatmul.mubr.msk.f32.vlgmr.msra.gmra.mrb[4].mxu0 %vm476_vm4, %v1073_v42 }
 0x2eb   :  { %v519_v46 = vsel %vm476_vm4, %v1075_v44, 0.0  ;;  %1006 = vmatprep.mubr.msk.f32.mxu1 %vm476_vm4, %v1075_v44  ;;  %1010 = vmatpush3.msk.msra.mxu0 %vm542_vm3, %v267_v9 }
 0x2ec   :  { %v520_v47 = vrot.slane %v519_v46, 4  ;;  %v528_v48 = vadd.f32 %v527_v45, %v526_v43  ;;  %1007 = vmatmul.mubr.msk.f32.vlgmr.msra.gmra.mrb[4].mxu1 %vm476_vm4, %v1071_v41  ;;  %1011 = vmatprep.mubr.msk.f32.mxu0 %vm1155_vm0, %v1156_v1 }
 0x2ed   :  { %1022 = vmatprep.mubr.msk.f32.mxu1 %vm1155_vm0, %v1156_v1  ;;  %1055 = vmatpush3.bf16.msra.mxu1 %v1054_v63  ;;  %v804_v1 = vld [vmem:[#allocation5 + $0x10] sm:$0xff] }
 0x2ee   :  { %v521_v49 = vadd.f32 %v520_v47, %v519_v46  ;;  %v529_v50 = vrot.slane %v528_v48, 2  ;;  %1056 = vmatprep.subr.bf16.mxu1 %v1154_v0  ;;  %v1057_v3 = vpack.c.bf16 %v805_v2, %v804_v1 }
 0x2f0   :  { %v522_v51 = vrot.slane %v521_v49, 2  ;;  %v530_v52 = vadd.f32 %v529_v50, %v528_v48 }
 0x2f1   :  { %1058 = vmatpush3.bf16.msra.mxu1 %v1057_v3 }
 0x2f2   :  { %v523_v53 = vadd.f32 %v522_v51, %v521_v49  ;;  %v531_v54 = vrot.slane %v530_v52, 1 }
 0x2f4   :  { %v524_v55 = vrot.slane %v523_v53, 1  ;;  %v532_v56 = vadd.f32 %v531_v54, %v530_v52 }
 0x2f6   :  { %v525_v57 = vadd.f32 %v524_v55, %v523_v53 }
 0x2f8   :  { %v535_v58 = vsel %vm107_vm2, %v532_v56, %v525_v57 }
 0x2f9   :  { %v537_v59 = vadd.f32 %v1073_v42, %v535_v58 }
 0x2fb   :  { %1076 = vrcp.f32 %v537_v59 }
 0x305   :  { %v1077_v60 = vpop.eup %1076 }
 0x306   :  { %1012 = vmatmul.mubr.msk.f32.vlgmr.msra.gmra.mrb[6].mxu0 %vm476_vm4, %v1077_v60 }
 0x3bd   :  { %v612_v4 = vpop.f32.mrb[4].mxu0 }
 0x3be   :  { %v1003_v5 = vpop.f32.mrb[5].mxu0  ;;  %v773_v26 = vmul.f32 %v771_v24, %v612_v4 }
 0x3bf   :  { %v1008_v7 = vpop.f32.mrb[4].mxu1 }
 0x3c0   :  { %v781_v9 = vmul.f32 %v1008_v7, %v777_v6  ;;  %v688_v10 = vpop.f32.mrb[5].mxu1 }
 0x3c1   :  { %v780_v11 = vmul.f32 %v775_v8, %v688_v10 }
 0x3c2   :  { %v789_v12 = vsel %vm63_vm1, %v781_v9, 0.0 }
 0x3c3   :  { %v790_v13 = vrot.slane %v789_v12, 4  ;;  %v782_v14 = vsel %vm63_vm1, %v780_v11, 0.0 }
 0x3c4   :  { %v783_v15 = vrot.slane %v782_v14, 4 }
 0x3c5   :  { %v791_v16 = vadd.f32 %v790_v13, %v789_v12 }
 0x3c6   :  { %v784_v0 = vadd.f32 %v783_v15, %v782_v14 }
 0x3c7   :  { %v792_v17 = vrot.slane %v791_v16, 2 }
 0x3c8   :  { %v785_v18 = vrot.slane %v784_v0, 2 }
 0x3c9   :  { %v793_v19 = vadd.f32 %v792_v17, %v791_v16 }
 0x3ca   :  { %v786_v20 = vadd.f32 %v785_v18, %v784_v0 }
 0x3cb   :  { %v794_v21 = vrot.slane %v793_v19, 1 }
 0x3cc   :  { %v787_v22 = vrot.slane %v786_v20, 1 }
 0x3cd   :  { %v795_v23 = vadd.f32 %v794_v21, %v793_v19 }
 0x3ce   :  { %v788_v25 = vadd.f32 %v787_v22, %v786_v20 }
 0x3d0   :  { %v798_v27 = vsel %vm107_vm2, %v795_v23, %v788_v25 }
 0x3d1   :  { %v800_v28 = vadd.f32 %v798_v27, %v773_v26 }
 0x3d9   :  { %v766_v29 = vpop.f32.mrb[6].mxu0 }
 0x3da   :  { %v801_v30 = vmul.f32 %v800_v28, %v766_v29  ;;  %v1013_v31 = vpop.f32.mrb[7].mxu0 }
 0x3dc   :  { %1023 = vmatmul.mubr.msk.f32.vlgmr.msra.gmra.mrb[6].mxu1 %vm63_vm1, %v801_v30 }
 0x4af   :  { %v882_v33 = vpop.f32.mrb[6].mxu1 }
 0x4b0   :  { %v883_v34 = vadd.f32 %v919_v32, %v882_v33  ;;  %v1024_v35 = vpop.f32.mrb[7].mxu1 }
 0x4b2   :  { %887 = vst.msk [vmem:[#allocation7] sm:$0x3] %vm886_vm5, %v883_v34 }
 0x4b3   :  { %1133 = shalt.err (!%p1130_p6)
}
 0x4b4   :  { %s1134_s5 = scalar_lea.hbm %s1346_s9, 32 }
 0x4b5   :  { %p1135_p7 = scmp.ne.s32.totalorder %s1346_s9, %s1134_s5  ;;  %p1138_p8 = scmp.lt.u32.totalorder %s1134_s5, %s1346_s9 }
 0x4b7   :  { %p1140_p9 = pnand %p1138_p8, %p1135_p7 }
 0x4b9   :  { %1143 = shalt.err (!%p1140_p9)
}
 0x4ba   :  { %897 = dma.vmem_to_hbm [thread:$0]  %s895_s13, 32, %s1346_s9, [#allocation4]  }
 0x4bb   :  { %1148 = dma.done.wait [#allocation4], 32  }
 0x4bc   :  { %1149 = vsyncadd [#allocation4], 4294967264 }
 0x4bd   :  { %901 = vsyncpa [#allocation3], 1 }
 0x4be   :  { %902 = vsyncpa [#allocation6], 1 }
 0x4bf   :  { %903 = vsyncpa [#allocation4], 1 }

</bundles_post_ra>
